<compile_context>
chip_gen: v5e
topology: v5e:2x2
jax: 0.10.0
libtpu: 0.0.40
codegen_flags: <defaults>
</compile_context>

<pallas_src>
import functools

import jax
import jax.numpy as jnp
from jax.experimental import pallas as pl
from jax.experimental.pallas import tpu as pltpu


def _cdiv(a, b):
    return -(-a // b)


def _round_up(a, b):
    return _cdiv(a, b) * b


def _sublane_pack(dtype):
    # Sub-32-bit dtypes pack along sublanes: bf16 vreg is (16,128), int8 (32,128).
    return {1: 32, 2: 16, 4: 8}.get(jnp.dtype(dtype).itemsize, 8)


# ----------------------------------------------------------------------------
# Kernel 1: generic residual add   out = fx + x   (lane-dense, copy-free wrapper)
# ----------------------------------------------------------------------------
def _residual_add_kernel(fx_ref, x_ref, o_ref):
    o_ref[...] = fx_ref[...] + x_ref[...]


def _pick_lane(total, max_lane):
    """Largest multiple of 128 <= max_lane that divides total (total % 128 == 0)."""
    cand = min(max_lane, total)
    cand -= cand % 128
    while cand > 128 and total % cand != 0:
        cand -= 128
    return max(cand, 128)


@functools.partial(jax.jit, static_argnames=("max_lane", "max_rows"))
def residual_add(fx, x, *, max_lane=2048, max_rows=512):
    """Elementwise fn(x) + x.

    The tensor is flattened to (rows, lane) with `lane` a large multiple of 128
    chosen to divide the total element count, so no wrapper-side padding or
    trailing-slice copies are needed in the common case (the add is HBM-bound:
    every extra copy is ~an extra full read+write).  Row tiles are big
    (up to 512 x 2048, ~4 MiB f32) for near-roofline DMA, and the grid is split
    into >= 2 blocks whenever possible so both v7x TensorCores get work.
    Ragged (non-128-aligned) sizes fall back to a minimal pad.
    """
    assert fx.shape == x.shape and fx.dtype == x.dtype
    orig_shape = x.shape
    total = 1
    for s in orig_shape:
        total *= s

    pack = _sublane_pack(x.dtype)

    if total % 128 == 0:
        lane = _pick_lane(total, max_lane)
        rows = total // lane
        fx2 = fx.reshape(rows, lane)
        x2 = x.reshape(rows, lane)
        padded = False
    else:
        # Ragged fallback (rare): minimal pad to a lane-dense rectangle.
        lane = min(max_lane, _round_up(total, 128))
        rows = _cdiv(total, lane)
        pad = rows * lane - total
        fx2 = jnp.pad(fx.reshape(-1), (0, pad)).reshape(rows, lane)
        x2 = jnp.pad(x.reshape(-1), (0, pad)).reshape(rows, lane)
        padded = True

    # Tile rows: multiple of the dtype's sublane packing (or the full extent).
    if rows <= max_rows:
        if rows >= 2 * pack:
            # Split into >= 2 blocks so a v7x megacore isn't left half idle.
            tile_rows = _round_up(_cdiv(rows, 2), pack)
        else:
            tile_rows = rows              # full-extent block, exempt from (8,128)
    else:
        tile_rows = _round_up(max_rows, pack)
    grid_rows = _cdiv(rows, tile_rows)    # partial last block handled by Pallas

    tile_bytes = tile_rows * lane * jnp.dtype(x.dtype).itemsize
    # 3 arrays x double buffer + headroom; ~28 MiB at the default (512, 2048) f32
    # tiles — fits v7x's 64 MiB physical VMEM and clears v5e's 16 MiB default.
    vmem_limit = max(6 * tile_bytes + (4 << 20), 16 << 20)

    out = pl.pallas_call(
        _residual_add_kernel,
        out_shape=jax.ShapeDtypeStruct((rows, lane), x.dtype),
        grid_spec=pltpu.PrefetchScalarGridSpec(
            num_scalar_prefetch=0,
            grid=(grid_rows,),
            in_specs=[
                pl.BlockSpec((tile_rows, lane), lambda i: (i, 0)),
                pl.BlockSpec((tile_rows, lane), lambda i: (i, 0)),
            ],
            out_specs=pl.BlockSpec((tile_rows, lane), lambda i: (i, 0)),
        ),
        input_output_aliases={0: 0},          # fx is dead after the add
        compiler_params=pltpu.CompilerParams(
            dimension_semantics=("parallel",),
            vmem_limit_bytes=vmem_limit,
        ),
    )(fx2, x2)

    if padded:
        return out.reshape(-1)[:total].reshape(orig_shape)
    return out.reshape(orig_shape)


class Residual:
    """out = fn(x) + x.

    `fn` runs as ordinary JAX (arbitrary callable, so it cannot live inside the
    Pallas kernel); the residual add runs as a Pallas kernel when
    `use_pallas_add=True`.  If fn(x) would otherwise stay fused (not forced to
    materialize in HBM), prefer `use_pallas_add=False` and let XLA fuse the add,
    or use the fully fused `residual_linear` below when fn is a Linear layer.
    """

    def __init__(self, fn, use_pallas_add=True):
        self.fn = fn
        self.use_pallas_add = use_pallas_add

    def __call__(self, x, *args, **kwargs):
        fx = self.fn(x, *args, **kwargs)
        if self.use_pallas_add:
            return residual_add(fx, x)
        return fx + x


# ----------------------------------------------------------------------------
# Kernel 2: fused Residual(Linear) — tiled matmul + bias + residual epilogue
# ----------------------------------------------------------------------------
def _fused_linear_residual_kernel(x_ref, w_ref, b_ref, xres_ref, o_ref, acc_ref):
    k = pl.program_id(2)

    @pl.when(k == 0)
    def _():
        # Initialize the accumulator with the (VMEM-resident) bias block, so the
        # epilogue only adds the residual.
        acc_ref[...] = jnp.broadcast_to(
            b_ref[...].astype(jnp.float32), acc_ref.shape)

    acc_ref[...] += jnp.dot(x_ref[...], w_ref[...],
                            preferred_element_type=jnp.float32)

    @pl.when(k == pl.num_programs(2) - 1)
    def _():
        o_ref[...] = (acc_ref[...] + xres_ref[...].astype(jnp.float32)
                      ).astype(o_ref.dtype)


def _pick_feature_tile(d, target):
    """Largest multiple of 128 <= target that divides d; else the full dim."""
    if d % 128 == 0:
        t = max(128, min(target, d))
        t -= t % 128
        while d % t != 0:
            t -= 128
        return t
    # TODO(synk): feature dims that are neither 128-aligned nor small enough to
    # be a single block would need feature-axis padding of W/b as well.
    return d


@functools.partial(jax.jit, static_argnames=("tile_m", "tile_n", "tile_k"))
def residual_linear(x, w, b, *, tile_m=512, tile_n=512, tile_k=512):
    """Residual(nn.Linear(D, D)): out = x @ W + b + x, fully inside Pallas.

    Tiled (M, N, K) grid with an f32 VMEM accumulator; M/N axes are parallel
    (megacore-shardable), K is the reduction ("arbitrary").  tile_m defaults to
    512 (halves weight re-streaming vs 256), K collapses to a single block when
    D <= 2048, and M is never padded — the last M block is partial.
    """
    orig_shape = x.shape
    d = orig_shape[-1]
    assert w.shape == (d, d), "Residual(Linear) requires a square weight (D, D)"
    assert b.shape == (d,)
    m = 1
    for s in orig_shape[:-1]:
        m *= s

    pack = _sublane_pack(x.dtype)

    tn = _pick_feature_tile(d, tile_n)
    # Single K block when the whole (D, tn) weight panel comfortably fits VMEM.
    tk_target = d if (d % 128 == 0 and d <= 2048) else tile_k
    tk = _pick_feature_tile(d, tk_target)

    if m >= tile_m:
        tm = _round_up(tile_m, pack)
    else:
        tm = m                               # full-extent block, exempt from (8,128)
    grid_m = _cdiv(m, tm)
    grid_n = d // tn
    grid_k = d // tk
    grid = (grid_m, grid_n, grid_k)

    x2 = x.reshape(m, d)
    b2 = b.reshape(1, d)

    itemsize = jnp.dtype(x.dtype).itemsize
    # Double-buffered input/output blocks + f32 accumulator + headroom.
    block_bytes = (tm * tk + tk * tn + tn + 2 * tm * tn) * itemsize
    vmem_limit = max(2 * block_bytes + tm * tn * 4 + (4 << 20), 16 << 20)

    flops = 2 * m * d * d
    bytes_accessed = (
        m * d * itemsize * grid_n                 # LHS x, re-read per N block
        + d * d * jnp.dtype(w.dtype).itemsize * grid_m   # W, re-streamed per M block
        + d * jnp.dtype(b.dtype).itemsize * grid_m * grid_n
        + m * d * itemsize                        # residual x read
        + m * d * itemsize)                       # output write

    out = pl.pallas_call(
        _fused_linear_residual_kernel,
        out_shape=jax.ShapeDtypeStruct((m, d), x.dtype),
        grid_spec=pltpu.PrefetchScalarGridSpec(
            num_scalar_prefetch=0,
            grid=grid,
            in_specs=[
                pl.BlockSpec((tm, tk), lambda i, j, k: (i, k)),   # LHS x
                pl.BlockSpec((tk, tn), lambda i, j, k: (k, j)),   # weight
                pl.BlockSpec((1, tn), lambda i, j, k: (0, j)),    # bias
                pl.BlockSpec((tm, tn), lambda i, j, k: (i, j)),   # residual x
            ],
            out_specs=pl.BlockSpec((tm, tn), lambda i, j, k: (i, j)),
            scratch_shapes=[pltpu.VMEM((tm, tn), jnp.float32)],
        ),
        compiler_params=pltpu.CompilerParams(
            dimension_semantics=("parallel", "parallel", "arbitrary"),
            vmem_limit_bytes=vmem_limit,
        ),
        cost_estimate=pl.CostEstimate(
            flops=flops, transcendentals=0, bytes_accessed=bytes_accessed),
    )(x2, w, b2, x2)
    return out.reshape(orig_shape)


if __name__ == "__main__":
    key = jax.random.PRNGKey(0)
    k_x, k_w, k_b = jax.random.split(key, 3)

    B, N, D = 2, 8, 32                    # batch, seq, hidden (small example)
    x = jax.random.normal(k_x, (B, N, D), dtype=jnp.float32)

    # Deterministic parameters for the example inner fn (a Linear layer).
    w = jax.random.normal(k_w, (D, D), dtype=jnp.float32) * 0.02
    b = jax.random.normal(k_b, (D,), dtype=jnp.float32) * 0.02

    # --- generic Residual: fn in JAX, lane-dense add in Pallas ---
    fn = lambda t: jnp.tanh(t @ w + b)    # any callable works
    res = Residual(fn)
    out_generic = jax.block_until_ready(res(x))
    ref_generic = fn(x) + x
    assert jnp.allclose(out_generic, ref_generic, atol=1e-5, rtol=1e-5)

    # --- fused Residual(Linear): matmul + bias + residual in one kernel ---
    out_fused = jax.block_until_ready(residual_linear(x, w, b))
    ref_fused = x @ w + b + x
    assert jnp.allclose(out_fused, ref_fused, atol=1e-4, rtol=1e-4)

    print("KERNEL_OK")
</pallas_src>

<mosaic_0001>
module attributes {stable_mosaic.version = 11 : i64} {
  func.func @_residual_add_kernel(%arg0: i32, %arg1: memref<1x512xf32, #tpu.memory_space<vmem>>, %arg2: memref<1x512xf32, #tpu.memory_space<vmem>>, %arg3: memref<1x512xf32, #tpu.memory_space<vmem>>) attributes {dimension_semantics = [#tpu.dimension_semantics<parallel>], iteration_bounds = array<i64: 1>, scalar_prefetch = 0 : i64, scratch_operands = 0 : i64, tpu.core_type = #tpu.core_type<tc>, window_params = [{transform_indices = @transform_0, window_bounds = array<i64: 1, 512>}, {transform_indices = @transform_1, window_bounds = array<i64: 1, 512>}, {transform_indices = @transform_2, window_bounds = array<i64: 1, 512>}]} {
    %c0 = arith.constant 0 : index
    %c0_0 = arith.constant 0 : index
    %0 = vector.load %arg1[%c0, %c0_0] : memref<1x512xf32, #tpu.memory_space<vmem>>, vector<1x512xf32>
    %c0_1 = arith.constant 0 : index
    %c0_2 = arith.constant 0 : index
    %1 = vector.load %arg2[%c0_1, %c0_2] : memref<1x512xf32, #tpu.memory_space<vmem>>, vector<1x512xf32>
    %2 = arith.addf %0, %1 : vector<1x512xf32>
    %c0_3 = arith.constant 0 : index
    %c0_4 = arith.constant 0 : index
    %3 = vector.load %arg3[%c0_3, %c0_4] : memref<1x512xf32, #tpu.memory_space<vmem>>, vector<1x512xf32>
    tpu.vector_store %arg3[%c0_3, %c0_4], %2 {strides = array<i32>} : memref<1x512xf32, #tpu.memory_space<vmem>>, vector<1x512xf32>,
    return
  }
  func.func @transform_0(%arg0: i32) -> (i32, i32) {
    %c0_i32 = arith.constant 0 : i32
    %c0_i32_0 = arith.constant 0 : i32
    return %arg0, %c0_i32 : i32, i32
  }
  func.func @transform_1(%arg0: i32) -> (i32, i32) {
    %c0_i32 = arith.constant 0 : i32
    %c0_i32_0 = arith.constant 0 : i32
    return %arg0, %c0_i32 : i32, i32
  }
  func.func @transform_2(%arg0: i32) -> (i32, i32) {
    %c0_i32 = arith.constant 0 : i32
    %c0_i32_0 = arith.constant 0 : i32
    return %arg0, %c0_i32 : i32, i32
  }
}

</mosaic_0001>

<bundles_post_ra>
// kernel: residual_add.1
= control target key start
LH: loop header
LB: loop body
LE: loop exit
PB: predicated region body
PF: predicated region fallthrough
CT: control target
= control target key end

     0   :  { %v14_v0 = vlaneseq  ;;  %s47_s0 = inlined_call_operand.vmem [shape: f32[1,512], index: 0, kind: input, shape index: {}, may-alias: {0,2}]   ;;  %s48_s1 = inlined_call_operand.vmem [shape: f32[1,512], index: 1, kind: input, shape index: {}]   ;;  %s49_s2 = inlined_call_operand.vmem [shape: f32[1,512], index: 2, kind: output, shape index: {}, may-alias: {0,2}]  }
   0x1   :  { %v11_v1 = vld [vmem:[%s47_s0] sm:$0xf] }
   0x2   :  { %v12_v2 = vld [vmem:[%s48_s1] sm:$0xf]  ;;  %vm16_vm0 = vcmp.lt.s32.totalorder %v14_v0, 512 }
   0x3   :  { %v13_v3 = vadd.f32 %v12_v2, %v11_v1 }
   0x5   :  { %18 = vst.msk [vmem:[%s49_s2] sm:$0xf] %vm16_vm0, %v13_v3 }

</bundles_post_ra>
